<compile_context>
chip_gen: v5e
topology: v5e:2x2
jax: 0.10.0
libtpu: 0.0.40
codegen_flags: <defaults>
</compile_context>

<pallas_src>
import functools

import jax
import jax.numpy as jnp
from jax.experimental import pallas as pl
from jax.experimental.pallas import tpu as pltpu


def _round_up(x: int, m: int) -> int:
    return ((x + m - 1) // m) * m


def rff_mlp_kernel(x_ref, w_ref, b_ref, o_ref):
    # x_ref: (tm, K), w_ref: (tn, K) — PyTorch Linear layout, contracted on K
    # inside the kernel (MXU consumes the transposed operand directly).
    z = jax.lax.dot_general(
        x_ref[...], w_ref[...],
        dimension_numbers=(((1,), (1,)), ((), ())),
        preferred_element_type=jnp.float32,
    )
    # Bias add + cos in f32 on the VPU/EUP (safe on v5e, keeps phase accuracy).
    o_ref[...] = jnp.cos(z + b_ref[...].astype(jnp.float32)).astype(o_ref.dtype)


@functools.partial(jax.jit, static_argnames=("tm", "tn", "use_bf16_matmul"))
def rff_mlp_notrain(x, weight, bias, *, tm=512, tn=512, use_bf16_matmul=False):
    """Pallas equivalent of RFFMLP_notrain.forward: cos(x @ weight.T + bias).

    x:      [B, input_dim]
    weight: [output_dim, input_dim]   (PyTorch nn.Linear layout, NOT transposed)
    bias:   [output_dim]
    """
    B, K = x.shape
    N, K2 = weight.shape
    assert K == K2 and bias.shape == (N,)
    out_dtype = x.dtype

    # --- tile sizes: sublane-aligned batch tile, lane-dense feature tile ----
    tm = _round_up(min(tm, _round_up(B, 8)), 8)       # multiple of 8 sublanes
    tn = _round_up(min(tn, _round_up(N, 128)), 128)   # multiple of 128 lanes
    B_pad = _round_up(B, tm)
    N_pad = _round_up(N, tn)

    # Pad to exact grid multiples (lane-dense output => unmasked stores).
    # TODO(synk): for production, store weight/bias pre-padded so this pad is
    # done once, not per call.
    x_p = x if B_pad == B else jnp.pad(x, ((0, B_pad - B), (0, 0)))
    w_p = weight if N_pad == N else jnp.pad(weight, ((0, N_pad - N), (0, 0)))
    b_p = bias if N_pad == N else jnp.pad(bias, (0, N_pad - N))
    b2 = b_p.reshape(1, N_pad).astype(jnp.float32)

    if use_bf16_matmul:
        # bf16 MXU inputs, f32 accumulation (bias/cos stay f32 in-kernel).
        x_p = x_p.astype(jnp.bfloat16)
        w_p = w_p.astype(jnp.bfloat16)

    grid = (B_pad // tm, N_pad // tn)
    elem = jnp.dtype(x_p.dtype).itemsize
    cost = pl.CostEstimate(
        flops=2 * B_pad * K * N_pad,
        transcendentals=B_pad * N_pad,  # one cos per output element (EUP)
        bytes_accessed=(B_pad * K * elem + N_pad * K * elem
                        + N_pad * 4 + B_pad * N_pad * jnp.dtype(out_dtype).itemsize),
    )

    out = pl.pallas_call(
        rff_mlp_kernel,
        out_shape=jax.ShapeDtypeStruct((B_pad, N_pad), out_dtype),
        grid=grid,
        in_specs=[
            pl.BlockSpec((tm, K), lambda i, j: (i, 0)),   # x tile: rows i
            pl.BlockSpec((tn, K), lambda i, j: (j, 0)),   # weight rows for cols j
            pl.BlockSpec((1, tn), lambda i, j: (0, j)),   # bias slice for cols j
        ],
        out_specs=pl.BlockSpec((tm, tn), lambda i, j: (i, j)),
        compiler_params=pltpu.CompilerParams(
            dimension_semantics=("parallel", "parallel")),
        cost_estimate=cost,
    )(x_p, w_p, b2)

    # Strip padding back to the logical shape.
    return out[:B, :N]


if __name__ == "__main__":
    key = jax.random.PRNGKey(0)
    k_x, k_w, k_b = jax.random.split(key, 3)

    batch = 8
    input_dim = 32
    output_dim = 64

    # Deterministic "init": weight/bias ~ N(0, 5^2), matching nn.init.normal_(std=5).
    weight = 5.0 * jax.random.normal(k_w, (output_dim, input_dim), dtype=jnp.float32)
    bias = 5.0 * jax.random.normal(k_b, (output_dim,), dtype=jnp.float32)
    x = jax.random.normal(k_x, (batch, input_dim), dtype=jnp.float32)

    out = rff_mlp_notrain(x, weight, bias)
    jax.block_until_ready(out)

    # Reference check in plain JAX (f32 path, tight tolerance).
    ref = jnp.cos(x @ weight.T + bias)
    assert out.shape == (batch, output_dim)
    assert jnp.allclose(out, ref, atol=1e-5, rtol=1e-5)

    print("KERNEL_OK")
</pallas_src>

<mosaic_0001>
module attributes {stable_mosaic.version = 11 : i64} {
  func.func @rff_mlp_kernel(%arg0: i32, %arg1: i32, %arg2: memref<8x32xf32, #tpu.memory_space<vmem>>, %arg3: memref<128x32xf32, #tpu.memory_space<vmem>>, %arg4: memref<1x128xf32, #tpu.memory_space<vmem>>, %arg5: memref<8x128xf32, #tpu.memory_space<vmem>>) attributes {dimension_semantics = [#tpu.dimension_semantics<parallel>, #tpu.dimension_semantics<parallel>], iteration_bounds = array<i64: 1, 1>, scalar_prefetch = 0 : i64, scratch_operands = 0 : i64, tpu.core_type = #tpu.core_type<tc>, window_params = [{transform_indices = @transform_0, window_bounds = array<i64: 8, 32>}, {transform_indices = @transform_1, window_bounds = array<i64: 128, 32>}, {transform_indices = @transform_2, window_bounds = array<i64: 1, 128>}, {transform_indices = @transform_3, window_bounds = array<i64: 8, 128>}]} {
    %c0 = arith.constant 0 : index
    %c0_0 = arith.constant 0 : index
    %0 = vector.load %arg2[%c0, %c0_0] : memref<8x32xf32, #tpu.memory_space<vmem>>, vector<8x32xf32>
    %c0_1 = arith.constant 0 : index
    %c0_2 = arith.constant 0 : index
    %1 = vector.load %arg3[%c0_1, %c0_2] : memref<128x32xf32, #tpu.memory_space<vmem>>, vector<128x32xf32>
    %cst = arith.constant dense<0.000000e+00> : vector<8x128xf32>
    %2 = tpu.matmul %0, %1, %cst {dimension_numbers = #tpu.dot_dimension_numbers<[1], [1], [0], [0], [0, 0, 1, 0], [], []>} : vector<8x32xf32>, vector<128x32xf32>, vector<8x128xf32> -> vector<8x128xf32>
    %c0_3 = arith.constant 0 : index
    %c0_4 = arith.constant 0 : index
    %3 = vector.load %arg4[%c0_3, %c0_4] : memref<1x128xf32, #tpu.memory_space<vmem>>, vector<1x128xf32>
    %4 = vector.broadcast %3 : vector<1x128xf32> to vector<8x128xf32>
    %5 = arith.addf %2, %4 : vector<8x128xf32>
    %6 = math.cos %5 : vector<8x128xf32>
    %c0_5 = arith.constant 0 : index
    %c0_6 = arith.constant 0 : index
    %7 = vector.load %arg5[%c0_5, %c0_6] : memref<8x128xf32, #tpu.memory_space<vmem>>, vector<8x128xf32>
    tpu.vector_store %arg5[%c0_5, %c0_6], %6 {strides = array<i32>} : memref<8x128xf32, #tpu.memory_space<vmem>>, vector<8x128xf32>,
    return
  }
  func.func @transform_0(%arg0: i32, %arg1: i32) -> (i32, i32) {
    %c0_i32 = arith.constant 0 : i32
    %c0_i32_0 = arith.constant 0 : i32
    return %arg0, %c0_i32 : i32, i32
  }
  func.func @transform_1(%arg0: i32, %arg1: i32) -> (i32, i32) {
    %c0_i32 = arith.constant 0 : i32
    %c0_i32_0 = arith.constant 0 : i32
    return %arg1, %c0_i32 : i32, i32
  }
  func.func @transform_2(%arg0: i32, %arg1: i32) -> (i32, i32) {
    %c0_i32 = arith.constant 0 : i32
    %c0_i32_0 = arith.constant 0 : i32
    return %c0_i32, %arg1 : i32, i32
  }
  func.func @transform_3(%arg0: i32, %arg1: i32) -> (i32, i32) {
    %c0_i32 = arith.constant 0 : i32
    return %arg0, %arg1 : i32, i32
  }
}

</mosaic_0001>

<bundles_post_ra>
// kernel: rff_mlp_notrain.1
= control target key start
LH: loop header
LB: loop body
LE: loop exit
PB: predicated region body
PF: predicated region fallthrough
CT: control target
= control target key end

     0   :  { %vm36_vm0 = vcmask 261120   ;;  %s500_s0 = inlined_call_operand.vmem [shape: f32[8,32], index: 0, kind: input, shape index: {}]   ;;  %s501_s1 = inlined_call_operand.vmem [shape: f32[128,32], index: 1, kind: input, shape index: {}]   ;;  %s502_s2 = inlined_call_operand.vmem [shape: f32[1,128], index: 2, kind: input, shape index: {}]   ;;  %s503_s3 = inlined_call_operand.hbm [shape: f32[8,128], index: 3, kind: output, shape index: {}]  }
   0x1   :  { %v31_v0 = vld [vmem:[%s501_s1 + $0x78] sm:$0xff]  ;;  %v30_v1 = vld [vmem:[%s501_s1 + $0x70] sm:$0xff] }
   0x2   :  { %279 = vmatpush.xpose.msk.msra.mxu0 %vm36_vm0, %v31_v0 }
   0x3   :  { %8 = vsyncpa [#allocation3], 0  ;;  %v29_v2 = vld [vmem:[%s501_s1 + $0x68] sm:$0xff]  ;;  %v28_v3 = vld [vmem:[%s501_s1 + $0x60] sm:$0xff]  ;;  %v334_v31 = vmov 683565275  }
   0x4   :  { %v27_v4 = vld [vmem:[%s501_s1 + $0x58] sm:$0xff]  ;;  %v26_v5 = vld [vmem:[%s501_s1 + $0x50] sm:$0xff]  ;;  %v25_v6 = vld [vmem:[%s501_s1 + $0x48] sm:$0xff]  ;;  %v335_v33 = vmov 2475754826   ;;  %s270_s22 = sshll.u32 %s503_s3, 4  ;;  %s271_s22 = int_to_ptr.hbm [resolvable:$true] %s270_s22 }
   0x5   :  { %v24_v7 = vld [vmem:[%s501_s1 + $0x40] sm:$0xff]  ;;  %v23_v8 = vld [vmem:[%s501_s1 + $0x38] sm:$0xff]  ;;  %v22_v9 = vld [vmem:[%s501_s1 + $0x30] sm:$0xff]  ;;  %v336_v36 = vmov 2131351028  }
   0x6   :  { %280 = vmatpush.xpose.msk.msra.mxu0 %vm36_vm0, %v30_v1  ;;  %v21_v10 = vld [vmem:[%s501_s1 + $0x28] sm:$0xff]  ;;  %v20_v11 = vld [vmem:[%s501_s1 + $0x20] sm:$0xff]  ;;  %v19_v12 = vld [vmem:[%s501_s1 + $0x18] sm:$0xff]  ;;  %v337_v39 = vmov 2102212464  }
   0x7   :  { %v18_v13 = vld [vmem:[%s501_s1 + $0x10] sm:$0xff]  ;;  %v17_v14 = vld [vmem:[%s501_s1 + $0x8] sm:$0xff]  ;;  %v16_v15 = vld [vmem:[%s501_s1] sm:$0xff]  ;;  %v338_v42 = vmov 920167782  }
   0x8   :  { %v15_v16 = vld [vmem:[%s500_s0] sm:$0xff]  ;;  %v339_v45 = vmov 1326507024   ;;  %s341_s0 = smov [#allocation2]  }
   0x9   :  { %v307_v17 = vld [vmem:[%s502_s2] ss:$0 sm:$0xff]  ;;  %s268_s1 = sshll.u32 %s341_s0, 4  ;;  %s269_s1 = int_to_ptr.vmem [resolvable:$true] %s268_s1 }
   0xa   :  { %281 = vmatpush.xpose.msk.msra.mxu0 %vm36_vm0, %v29_v2 }
   0xe   :  { %282 = vmatpush.xpose.msk.msra.mxu0 %vm36_vm0, %v28_v3 }
  0x12   :  { %283 = vmatpush.xpose.msk.msra.mxu0 %vm36_vm0, %v27_v4 }
  0x16   :  { %284 = vmatpush.xpose.msk.msra.mxu0 %vm36_vm0, %v26_v5 }
  0x1a   :  { %285 = vmatpush.xpose.msk.msra.mxu0 %vm36_vm0, %v25_v6 }
  0x1e   :  { %286 = vmatpush.xpose.msk.msra.mxu0 %vm36_vm0, %v24_v7 }
  0x22   :  { %287 = vmatpush.xpose.msk.msra.mxu0 %vm36_vm0, %v23_v8 }
  0x26   :  { %288 = vmatpush.xpose.msk.msra.mxu0 %vm36_vm0, %v22_v9 }
  0x2a   :  { %289 = vmatpush.xpose.msk.msra.mxu0 %vm36_vm0, %v21_v10 }
  0x2e   :  { %290 = vmatpush.xpose.msk.msra.mxu0 %vm36_vm0, %v20_v11 }
  0x32   :  { %291 = vmatpush.xpose.msk.msra.mxu0 %vm36_vm0, %v19_v12 }
  0x36   :  { %292 = vmatpush.xpose.msk.msra.mxu0 %vm36_vm0, %v18_v13 }
  0x3a   :  { %293 = vmatpush.xpose.msk.msra.mxu0 %vm36_vm0, %v17_v14 }
  0x3e   :  { %294 = vmatpush.xpose.msk.msra.mxu0 %vm36_vm0, %v16_v15  ;;  %v340_v15 = vmov 0  }
  0x41   :  { %295 = vmatmul.msk.f32.vlgmr.msra.gmra.mxu0 %vm36_vm0, %v15_v16 }
  0xbe   :  { %v105_v18 = vpop.f32.mrf.mxu0 }
  0xbf   :  { %v433_v19 = vadd.f32 %v307_v17, %v105_v18 }
  0xc1   :  { %v111_v20 = vand.u32 2139095040, %v433_v19  ;;  %v108_v23 = vand.u32 2147483647, %v433_v19  ;;  %vm110_vm13 = vcmp.lt.s32.totalorder %v433_v19, 0 }
  0xc3   :  { %v112_v21 = vshrl.u32 %v111_v20, 23  ;;  %v115_v25 = vand.u32 8388607, %v108_v23  ;;  %vm487_vm14 = vcmp.le.f32.partialorder %v108_v23, 0.7853982 }
  0xc5   :  { %v296_v22 = vadd.s32 4294967169, %v112_v21  ;;  %v116_v29 = vor.u32 8388608, %v115_v25 }
  0xc7   :  { %v118_v24 = vadd.s32 1, %v296_v22  ;;  %v450_v52 = vshll.u32 %v116_v29, 8 }
  0xc9   :  { %vm119_vm1 = vcmp.gt.s32.totalorder %v118_v24, 0  ;;  %v157_v61 = vand.u32 65535, %v450_v52  ;;  %v158_v62 = vshrl.u32 %v450_v52, 16 }
  0xca   :  { %v120_v26 = vsel %vm119_vm1, %v118_v24, 0 }
  0xcb   :  { %v122_v27 = vand.u32 31, %v120_v26  ;;  %v441_v30 = vshrl.u32 %v120_v26, 5 }
  0xcd   :  { %v439_v28 = vsub.s32 32, %v122_v27  ;;  %v125_v32 = vshll.u32 %v334_v31, %v122_v27  ;;  %v128_v34 = vshll.u32 %v335_v33, %v122_v27  ;;  %v131_v38 = vshll.u32 %v336_v36, %v122_v27 }
  0xce   :  { %v134_v41 = vshll.u32 %v337_v39, %v122_v27  ;;  %v137_v44 = vshll.u32 %v338_v42, %v122_v27  ;;  %vm140_vm2 = vcmp.lt.s32.totalorder %v441_v30, 1  ;;  %vm143_vm3 = vcmp.lt.s32.totalorder %v441_v30, 4 }
  0xcf   :  { %v126_v35 = vshrl.u32 %v335_v33, %v439_v28  ;;  %v129_v37 = vshrl.u32 %v336_v36, %v439_v28  ;;  %v132_v40 = vshrl.u32 %v337_v39, %v439_v28  ;;  %v135_v43 = vshrl.u32 %v338_v42, %v439_v28 }
  0xd0   :  { %v138_v46 = vshrl.u32 %v339_v45, %v439_v28  ;;  %vm142_vm4 = vcmp.lt.s32.totalorder %v441_v30, 3  ;;  %vm141_vm5 = vcmp.lt.s32.totalorder %v441_v30, 2  ;;  %v124_v26 = vshrl.u32 %v334_v31, %v439_v28 }
  0xd1   :  { %v127_v47 = vor.u32 %v126_v35, %v125_v32  ;;  %v130_v48 = vor.u32 %v129_v37, %v128_v34  ;;  %v133_v49 = vor.u32 %v132_v40, %v131_v38  ;;  %v136_v50 = vor.u32 %v135_v43, %v134_v41 }
  0xd2   :  { %v139_v51 = vor.u32 %v138_v46, %v137_v44 }
  0xd3   :  { %v148_v53 = vsel %vm140_vm2, %v127_v47, %v130_v48  ;;  %v152_v54 = vsel %vm140_vm2, %v130_v48, %v133_v49  ;;  %v149_v55 = vsel %vm143_vm3, %v136_v50, 920167782  ;;  %v145_v22 = vsel %vm143_vm3, %v133_v49, 2102212464 }
  0xd4   :  { %v153_v56 = vsel %vm143_vm3, %v139_v51, 1326507024  ;;  %v150_v57 = vsel %vm142_vm4, %v133_v49, %v149_v55  ;;  %v144_v35 = vsel %vm140_vm2, %v124_v26, %v127_v47  ;;  %v146_v36 = vsel %vm142_vm4, %v130_v48, %v145_v22 }
  0xd5   :  { %v154_v58 = vsel %vm142_vm4, %v136_v50, %v153_v56  ;;  %v151_v59 = vsel %vm141_vm5, %v148_v53, %v150_v57  ;;  %v147_v28 = vsel %vm141_vm5, %v144_v35, %v146_v36  ;;  %vm251_vm2 = vweird.f32 %v433_v19 }
  0xd6   :  { %v155_v60 = vsel %vm141_vm5, %v152_v54, %v154_v58  ;;  %v181_v1 = vand.u32 65535, %v151_v59  ;;  %v182_v2 = vshrl.u32 %v151_v59, 16  ;;  %v201_v44 = vmul.u32 %v450_v52, %v147_v28 }
  0xd7   :  { %v159_v63 = vand.u32 65535, %v155_v60  ;;  %v160_v0 = vshrl.u32 %v155_v60, 16 }
  0xd8   :  { %v184_v5 = vmul.u32 %v182_v2, %v157_v61  ;;  %v185_v6 = vmul.u32 %v181_v1, %v158_v62  ;;  %v183_v10 = vmul.u32 %v181_v1, %v157_v61  ;;  %v186_v14 = vmul.u32 %v182_v2, %v158_v62 }
  0xd9   :  { %v162_v3 = vmul.u32 %v160_v0, %v157_v61  ;;  %v163_v4 = vmul.u32 %v159_v63, %v158_v62  ;;  %v161_v7 = vmul.u32 %v159_v63, %v157_v61  ;;  %v164_v9 = vmul.u32 %v160_v0, %v158_v62 }
  0xda   :  { %v187_v11 = vshll.u32 %v184_v5, 16  ;;  %v189_v17 = vshll.u32 %v185_v6, 16  ;;  %v188_v33 = vshrl.u32 %v184_v5, 16  ;;  %v190_v39 = vshrl.u32 %v185_v6, 16 }
  0xdb   :  { %v165_v8 = vshll.u32 %v162_v3, 16  ;;  %v167_v12 = vshll.u32 %v163_v4, 16  ;;  %v166_v27 = vshrl.u32 %v162_v3, 16  ;;  %v168_v37 = vshrl.u32 %v163_v4, 16 }
  0xdc   :  { %vm191_vm7 = vc.u32 %v183_v10, %v187_v11  ;;  %v193_v18 = vadd.s32 %v187_v11, %v183_v10 }
  0xdd   :  { %vm169_vm6 = vc.u32 %v161_v7, %v165_v8  ;;  %v171_v13 = vadd.s32 %v165_v8, %v161_v7  ;;  %v192_v21 = vsel %vm191_vm7, 1, %v340_v15 }
  0xde   :  { %v170_v16 = vsel %vm169_vm6, 1, %v340_v15  ;;  %v194_v25 = vadd.s32 %v192_v21, %v186_v14  ;;  %vm195_vm9 = vc.u32 %v193_v18, %v189_v17  ;;  %v197_v42 = vadd.s32 %v193_v18, %v189_v17 }
  0xdf   :  { %v172_v20 = vadd.s32 %v170_v16, %v164_v9  ;;  %vm173_vm8 = vc.u32 %v171_v13, %v167_v12  ;;  %v196_v32 = vsel %vm195_vm9, 1, %v340_v15 }
  0xe0   :  { %v174_v24 = vsel %vm173_vm8, 1, %v340_v15  ;;  %v198_v34 = vadd.s32 %v196_v32, %v194_v25 }
  0xe1   :  { %v176_v29 = vadd.s32 %v174_v24, %v172_v20 }
  0xe2   :  { %v199_v40 = vadd.s32 %v198_v34, %v188_v33 }
  0xe3   :  { %v177_v38 = vadd.s32 %v176_v29, %v166_v27 }
  0xe4   :  { %v200_v31 = vadd.s32 %v199_v40, %v190_v39 }
  0xe5   :  { %v178_v41 = vadd.s32 %v177_v38, %v168_v37 }
  0xe6   :  { %v204_v43 = vadd.s32 1, %v200_v31 }
  0xe7   :  { %vm203_vm10 = vc.u32 %v178_v41, %v197_v42  ;;  %v202_v30 = vadd.s32 %v197_v42, %v178_v41 }
  0xe8   :  { %v205_v45 = vsel %vm203_vm10, %v204_v43, %v200_v31 }
  0xe9   :  { %v206_v46 = vadd.s32 %v205_v45, %v201_v44 }
  0xeb   :  { %v207_v47 = vadd.s32 536870912, %v206_v46 }
  0xed   :  { %v208_v49 = vshrl.u32 %v207_v47, 30 }
  0xef   :  { %v209_v50 = vshll.u32 %v208_v49, 30  ;;  %v232_v10 = vsub.s32 4, %v208_v49 }
  0xf1   :  { %v210_v48 = vsub.s32 %v206_v46, %v209_v50  ;;  %v233_v15 = vsel %vm110_vm13, %v232_v10, %v208_v49 }
  0xf2   :  { %v235_v23 = vsel %vm487_vm14, 0, %v233_v15 }
  0xf3   :  { %vm211_vm11 = vcmp.lt.s32.totalorder %v210_v48, 0  ;;  %v212_v51 = vsub.s32 0, %v210_v48  ;;  %v252_v24 = vand.u32 3, %v235_v23 }
  0xf5   :  { %v213_v53 = vsel %vm211_vm11, %v212_v51, %v210_v48  ;;  %vm254_vm15 = vcmp.eq.s32.totalorder %v252_v24, 0  ;;  %vm257_vm0 = vcmp.eq.s32.totalorder %v252_v24, 2  ;;  %vm253_vm1 = vcmp.lt.s32.totalorder %v252_v24, 2 }
  0xf6   :  { %v214_v54 = vclz %v213_v53 }
  0xf8   :  { %v297_v55 = vadd.s32 4294967294, %v214_v54 }
  0xfa   :  { %vm298_vm12 = vcmp.lt.s32.totalorder %v297_v55, 0 }
  0xfb   :  { %v217_v56 = vsel %vm298_vm12, 0, %v297_v55 }
  0xfc   :  { %v218_v57 = vsub.s32 32, %v217_v56  ;;  %v222_v58 = vsub.s32 4294967266, %v217_v56  ;;  %v219_v59 = vshll.u32 %v210_v48, %v217_v56 }
  0xfe   :  { %v220_v60 = vshrl.u32 %v202_v30, %v218_v57  ;;  %v223_v61 = vadd.s32 127, %v222_v58 }
 0x100   :  { %v221_v52 = vor.u32 %v220_v60, %v219_v59  ;;  %v224_v62 = vshll.u32 %v223_v61, 23 }
 0x102   :  { %v225_v63 = vor.u32 4788187, %v224_v62  ;;  %v228_v1 = vcvt.s32.f32 %v221_v52 }
 0x104   :  { %v226_v0 = vand.u32 2147483647, %v225_v63 }
 0x106   :  { %v229_v2 = vmul.f32 %v228_v1, %v226_v0 }
 0x108   :  { %v230_v3 = vxor.u32 2147483648, %v229_v2 }
 0x10a   :  { %v231_v5 = vsel %vm110_vm13, %v230_v3, %v229_v2 }
 0x10b   :  { %v234_v6 = vsel %vm487_vm14, %v433_v19, %v231_v5 }
 0x10c   :  { %v236_v7 = vmul.f32 %v234_v6, %v234_v6 }
 0x10e   :  { %v237_v8 = vmul.f32 -0.001358992, %v236_v7  ;;  %v244_v9 = vmul.f32 -0.00019511016, %v236_v7 }
 0x110   :  { %v238_v11 = vadd.f32 0.041655596, %v237_v8  ;;  %v245_v12 = vadd.f32 0.008332121, %v244_v9 }
 0x112   :  { %v239_v13 = vmul.f32 %v238_v11, %v236_v7  ;;  %v246_v14 = vmul.f32 %v245_v12, %v236_v7 }
 0x114   :  { %v240_v16 = vadd.f32 -0.4999988, %v239_v13  ;;  %v247_v17 = vadd.f32 -0.16666654, %v246_v14 }
 0x116   :  { %v241_v18 = vmul.f32 %v240_v16, %v236_v7  ;;  %v248_v20 = vmul.f32 %v247_v17, %v236_v7 }
 0x118   :  { %v242_v21 = vadd.f32 1.0, %v241_v18  ;;  %v249_v22 = vadd.f32 1.0, %v248_v20 }
 0x11a   :  { %v250_v25 = vmul.f32 %v249_v22, %v234_v6  ;;  %v258_v26 = vxor.u32 2147483648, %v242_v21 }
 0x11c   :  { %v255_v27 = vxor.u32 2147483648, %v250_v25  ;;  %v259_v32 = vsel %vm257_vm0, %v258_v26, %v250_v25 }
 0x11e   :  { %v256_v29 = vsel %vm254_vm15, %v242_v21, %v255_v27 }
 0x11f   :  { %v260_v33 = vsel %vm253_vm1, %v256_v29, %v259_v32 }
 0x120   :  { %v261_v34 = vsel %vm251_vm2, nan, %v260_v33 }
 0x121   :  { %262 = vst [vmem:[#allocation2] sm:$0xff] %v261_v34 }
 0x122   :  { %273 = dma.vmem_to_hbm [thread:$0]  %s269_s1, 128, %s271_s22, [#allocation3]  }
 0x123   :  { %332 = dma.done.wait [#allocation3], 128  }
 0x124   :  { %333 = vsyncadd [#allocation3], 4294967168 }
 0x125   :  { %278 = vsyncpa [#allocation3], 1 }

</bundles_post_ra>
